<compile_context>
chip_gen: v5e
topology: v5e:2x2
jax: 0.10.0
libtpu: 0.0.40
codegen_flags: <defaults>
</compile_context>

<pallas_src>
import functools

import jax
import jax.numpy as jnp
import numpy as np
from jax import lax
from jax.experimental import pallas as pl
from jax.experimental.pallas import tpu as pltpu


def _linkernel_kernel(d1_ref, d2_ref, o_ref):
    """One (tm, tn) output tile; reduction over L runs along grid axis 2."""
    k = pl.program_id(2)

    @pl.when(k == 0)
    def _():
        o_ref[...] = jnp.zeros_like(o_ref)

    # int8 {-2,0,2} / {-1,0,1} diffs -> bf16 (exact) -> single MXU matmul.
    a = d1_ref[...].astype(jnp.bfloat16)   # (tm, tk)
    b = d2_ref[...].astype(jnp.bfloat16)   # (tn, tk)

    # Contract the last dim of both operands (no in-kernel transpose),
    # accumulate in f32 directly into the resident output block.
    o_ref[...] += lax.dot_general(
        a, b,
        dimension_numbers=(((1,), (1,)), ((), ())),
        preferred_element_type=jnp.float32,
    )
    # No epilogue: the x2 factor is already folded into d1 (+/-2).


def _round_up(x, mult):
    return ((x + mult - 1) // mult) * mult


@functools.partial(jax.jit, static_argnames=("tm", "tn", "tk"))
def lin_kernel_forward(x1, x2, *, tm=512, tn=512, tk=1024):
    """LinKernel.forward(x1, x2) -> 2*(S2 - D2), shape (n, m) float32.

    Genotype codes other than {0, 2} contribute zero, exactly matching the
    PyTorch indicator semantics (the compares happen on the original values).
    """
    x1 = jnp.asarray(x1)
    x2 = jnp.asarray(x2)
    n, L = x1.shape
    m, L2 = x2.shape
    assert L == L2, "x1 and x2 must have the same number of loci L"

    # One cheap XLA elementwise pass per input: indicator difference, with the
    # final *2 folded into the x1 side.  int8 -> 4x less DMA than f32.
    d1 = ((x1 == 0).astype(jnp.int8) - (x1 == 2).astype(jnp.int8)) * jnp.int8(2)
    d2 = (x2 == 0).astype(jnp.int8) - (x2 == 2).astype(jnp.int8)

    # Effective tiles.  int8 inputs need sublane multiples of 32 on the
    # second-to-last block dim; lane dims (tn, tk) stay multiples of 128 so
    # output stores are unmasked `vst` and MXU tiles are full.
    tm_eff = min(_round_up(tm, 32), _round_up(n, 32))
    tn_eff = min(_round_up(tn, 128), _round_up(m, 128))
    tk_eff = min(_round_up(tk, 128), _round_up(L, 128))

    n_p = _round_up(n, tm_eff)
    m_p = _round_up(m, tn_eff)
    L_p = _round_up(L, tk_eff)

    # Pad the (already tiny, int8) diff arrays with 0: zero diffs contribute
    # exactly nothing to the contraction; padded rows/cols are sliced away.
    if (n_p, L_p) != (n, L):
        d1 = jnp.pad(d1, ((0, n_p - n), (0, L_p - L)))
    if (m_p, L_p) != (m, L):
        d2 = jnp.pad(d2, ((0, m_p - m), (0, L_p - L)))

    grid = (n_p // tm_eff, m_p // tn_eff, L_p // tk_eff)

    # Double-buffered inputs (int8) + double-buffered f32 output tile.
    vmem_bytes = 2 * (tm_eff + tn_eff) * tk_eff + 2 * tm_eff * tn_eff * 4
    vmem_limit = int(min(max(2 * vmem_bytes, 16 << 20), 48 << 20))

    cost = pl.CostEstimate(
        flops=2 * n_p * m_p * L_p,
        transcendentals=0,
        bytes_accessed=n_p * L_p + m_p * L_p + n_p * m_p * 4,
    )

    out = pl.pallas_call(
        _linkernel_kernel,
        out_shape=jax.ShapeDtypeStruct((n_p, m_p), jnp.float32),
        grid_spec=pltpu.PrefetchScalarGridSpec(
            num_scalar_prefetch=0,
            grid=grid,
            in_specs=[
                pl.BlockSpec((tm_eff, tk_eff), lambda i, j, k: (i, k)),  # d1
                pl.BlockSpec((tn_eff, tk_eff), lambda i, j, k: (j, k)),  # d2
            ],
            out_specs=pl.BlockSpec((tm_eff, tn_eff), lambda i, j, k: (i, j)),
        ),
        compiler_params=pltpu.CompilerParams(
            dimension_semantics=("parallel", "parallel", "arbitrary"),
            vmem_limit_bytes=vmem_limit,
        ),
        cost_estimate=cost,
    )(d1, d2)

    return out[:n, :m]


def _reference(x1, x2):
    """Pure-JAX re-implementation of the PyTorch d() + LinKernel.forward."""
    L = x1.shape[1]
    h0_1 = 1.0 * (x1 == 0.0)
    h1_1 = 1.0 * (x1 == 2.0)
    h0_2 = 1.0 * (x2 == 0.0)
    h1_2 = 1.0 * (x2 == 2.0)
    S1 = (x1 % 2) @ (x2 % 2).T
    S2 = h0_1 @ h0_2.T + h1_1 @ h1_2.T
    D2 = h0_1 @ h1_2.T + h1_1 @ h0_2.T
    D1 = L - S1 - S2 - D2
    diff = jnp.stack((S1, S2, D1, D2))
    return 2.0 * (diff[1] - diff[-1])


if __name__ == "__main__":
    key = jax.random.PRNGKey(0)
    k1, k2, k3, k4 = jax.random.split(key, 4)

    # Test 1: odd, unaligned shapes (exercises padding) plus genotype codes
    # outside {0,1,2} (exercises exact indicator semantics: they add zero).
    n, m, L = 48, 40, 300
    x1 = jax.random.randint(k1, (n, L), 0, 3).astype(jnp.float32)
    x2 = jax.random.randint(k2, (m, L), 0, 3).astype(jnp.float32)
    x1 = x1.at[0, :4].set(jnp.array([3.0, -9.0, 0.0, 2.0], jnp.float32))
    out = lin_kernel_forward(x1, x2)
    jax.block_until_ready(out)
    np.testing.assert_allclose(np.asarray(out), np.asarray(_reference(x1, x2)),
                               rtol=0, atol=0)

    # Test 2: small explicit tiles so the grid has >1 step on every axis
    # (exercises resident-output accumulation across the L axis).
    n, m, L = 64, 256, 384
    x1 = jax.random.randint(k3, (n, L), 0, 3).astype(jnp.float32)
    x2 = jax.random.randint(k4, (m, L), 0, 3).astype(jnp.float32)
    out = lin_kernel_forward(x1, x2, tm=32, tn=128, tk=128)
    jax.block_until_ready(out)
    np.testing.assert_allclose(np.asarray(out), np.asarray(_reference(x1, x2)),
                               rtol=0, atol=0)

    print("KERNEL_OK")
</pallas_src>

<mosaic_0001>
module attributes {stable_mosaic.version = 11 : i64} {
  func.func @_linkernel_kernel(%arg0: i32, %arg1: i32, %arg2: i32, %arg3: memref<64x384xi8, #tpu.memory_space<vmem>>, %arg4: memref<128x384xi8, #tpu.memory_space<vmem>>, %arg5: memref<64x128xf32, #tpu.memory_space<vmem>>) attributes {dimension_semantics = [#tpu.dimension_semantics<parallel>, #tpu.dimension_semantics<parallel>, #tpu.dimension_semantics<arbitrary>], iteration_bounds = array<i64: 1, 1, 1>, scalar_prefetch = 0 : i64, scratch_operands = 0 : i64, tpu.core_type = #tpu.core_type<tc>, window_params = [{transform_indices = @transform_0, window_bounds = array<i64: 64, 384>}, {transform_indices = @transform_1, window_bounds = array<i64: 128, 384>}, {transform_indices = @transform_2, window_bounds = array<i64: 64, 128>}]} {
    %c0_i32 = arith.constant 0 : i32
    %0 = arith.cmpi eq, %arg2, %c0_i32 : i32
    %1 = arith.extui %0 : i1 to i32
    %c0_i32_0 = arith.constant 0 : i32
    %2 = arith.cmpi ne, %1, %c0_i32_0 : i32
    scf.if %2 {
      %cst_8 = arith.constant 0.000000e+00 : f32
      %11 = vector.broadcast %cst_8 : f32 to vector<64x128xf32>
      %c0_9 = arith.constant 0 : index
      %c0_10 = arith.constant 0 : index
      %12 = vector.load %arg5[%c0_9, %c0_10] : memref<64x128xf32, #tpu.memory_space<vmem>>, vector<64x128xf32>
      tpu.vector_store %arg5[%c0_9, %c0_10], %11 {strides = array<i32>} : memref<64x128xf32, #tpu.memory_space<vmem>>, vector<64x128xf32>,
    } else {
    }
    %c0 = arith.constant 0 : index
    %c0_1 = arith.constant 0 : index
    %3 = vector.load %arg3[%c0, %c0_1] : memref<64x384xi8, #tpu.memory_space<vmem>>, vector<64x384xi8>
    %4 = arith.sitofp %3 : vector<64x384xi8> to vector<64x384xbf16>
    %c0_2 = arith.constant 0 : index
    %c0_3 = arith.constant 0 : index
    %5 = vector.load %arg4[%c0_2, %c0_3] : memref<128x384xi8, #tpu.memory_space<vmem>>, vector<128x384xi8>
    %6 = arith.sitofp %5 : vector<128x384xi8> to vector<128x384xbf16>
    %c0_4 = arith.constant 0 : index
    %c0_5 = arith.constant 0 : index
    %7 = vector.load %arg5[%c0_4, %c0_5] : memref<64x128xf32, #tpu.memory_space<vmem>>, vector<64x128xf32>
    %cst = arith.constant dense<0.000000e+00> : vector<64x128xf32>
    %8 = tpu.matmul %4, %6, %cst {dimension_numbers = #tpu.dot_dimension_numbers<[1], [1], [0], [0], [0, 0, 1, 0], [], []>} : vector<64x384xbf16>, vector<128x384xbf16>, vector<64x128xf32> -> vector<64x128xf32>
    %9 = arith.addf %7, %8 : vector<64x128xf32>
    %c0_6 = arith.constant 0 : index
    %c0_7 = arith.constant 0 : index
    %10 = vector.load %arg5[%c0_6, %c0_7] : memref<64x128xf32, #tpu.memory_space<vmem>>, vector<64x128xf32>
    tpu.vector_store %arg5[%c0_6, %c0_7], %9 {strides = array<i32>} : memref<64x128xf32, #tpu.memory_space<vmem>>, vector<64x128xf32>,
    return
  }
  func.func @transform_0(%arg0: i32, %arg1: i32, %arg2: i32) -> (i32, i32) {
    %c0_i32 = arith.constant 0 : i32
    return %arg0, %arg2 : i32, i32
  }
  func.func @transform_1(%arg0: i32, %arg1: i32, %arg2: i32) -> (i32, i32) {
    %c0_i32 = arith.constant 0 : i32
    return %arg1, %arg2 : i32, i32
  }
  func.func @transform_2(%arg0: i32, %arg1: i32, %arg2: i32) -> (i32, i32) {
    %c0_i32 = arith.constant 0 : i32
    return %arg0, %arg1 : i32, i32
  }
}

</mosaic_0001>

<bundles_post_ra>
// kernel: lin_kernel_forward.1
= control target key start
LH: loop header
LB: loop body
LE: loop exit
PB: predicated region body
PF: predicated region fallthrough
CT: control target
= control target key end

     0   :  { %s438_s1 = inlined_call_operand.vmem [shape: s8[128,384], index: 1, kind: input, shape index: {}]   ;;  %s439_s0 = inlined_call_operand.vmem [shape: s8[64,384], index: 0, kind: input, shape index: {}]   ;;  %s440_s2 = inlined_call_operand.vmem [shape: f32[64,128], index: 2, kind: output, shape index: {}]  }
   0x1   :  { %v98_v0 = vld [vmem:[%s438_s1 + $0x48] sm:$0xff]  ;;  %v99_v1 = vld [vmem:[%s438_s1 + $0x50] sm:$0xff]  ;;  %v100_v2 = vld [vmem:[%s438_s1 + $0x58] sm:$0xff] }
   0x2   :  { %v143_v3 = vunpack.c.2.s8 %v98_v0  ;;  %v146_v4 = vunpack.c.3.s8 %v98_v0  ;;  %v144_v5 = vunpack.c.2.s8 %v99_v1  ;;  %v147_v6 = vunpack.c.3.s8 %v99_v1  ;;  %v95_v28 = vld [vmem:[%s438_s1 + $0x30] sm:$0xff]  ;;  %v96_v31 = vld [vmem:[%s438_s1 + $0x38] sm:$0xff]  ;;  %v97_v32 = vld [vmem:[%s438_s1 + $0x40] sm:$0xff] }
   0x3   :  { %v145_v7 = vunpack.c.2.s8 %v100_v2  ;;  %v148_v8 = vunpack.c.3.s8 %v100_v2  ;;  %v137_v9 = vunpack.c.0.s8 %v98_v0  ;;  %v140_v10 = vunpack.c.1.s8 %v98_v0  ;;  %v92_v61 = vld [vmem:[%s438_s1 + $0x18] sm:$0xff]  ;;  %v93_v0 = vld [vmem:[%s438_s1 + $0x20] sm:$0xff] }
   0x4   :  { %v191_v11 = vcvt.s32.f32 %v143_v3  ;;  %v194_v12 = vcvt.s32.f32 %v146_v4  ;;  %v192_v13 = vcvt.s32.f32 %v144_v5  ;;  %v195_v14 = vcvt.s32.f32 %v147_v6 }
   0x5   :  { %v193_v15 = vcvt.s32.f32 %v145_v7  ;;  %v196_v16 = vcvt.s32.f32 %v148_v8  ;;  %v185_v17 = vcvt.s32.f32 %v137_v9  ;;  %v138_v20 = vunpack.c.0.s8 %v99_v1 }
   0x6   :  { %v218_v18 = vpack.c.bf16 %v194_v12, %v191_v11  ;;  %v219_v19 = vpack.c.bf16 %v195_v14, %v192_v13  ;;  %v141_v21 = vunpack.c.1.s8 %v99_v1  ;;  %v188_v23 = vcvt.s32.f32 %v140_v10  ;;  %v94_v1 = vld [vmem:[%s438_s1 + $0x28] sm:$0xff] }
   0x7   :  { %v220_v22 = vpack.c.bf16 %v196_v16, %v193_v15  ;;  %v139_v24 = vunpack.c.0.s8 %v100_v2  ;;  %v142_v25 = vunpack.c.1.s8 %v100_v2  ;;  %v186_v26 = vcvt.s32.f32 %v138_v20 }
   0x8   :  { %229 = vmatpush.bf16.xpose.msra.mxu0 %v218_v18  ;;  %258 = vmatpush.bf16.xpose.msra.mxu1 %v219_v19  ;;  %v189_v27 = vcvt.s32.f32 %v141_v21  ;;  %v215_v33 = vpack.c.bf16 %v188_v23, %v185_v17  ;;  %v131_v34 = vunpack.c.2.s8 %v95_v28  ;;  %v134_v36 = vunpack.c.3.s8 %v95_v28 }
   0x9   :  { %287 = vmatpush.bf16.xpose.msra.mxu2 %v220_v22  ;;  %336 = vmatpush.bf16.xpose.msra.mxu3 %v218_v18  ;;  %v187_v29 = vcvt.s32.f32 %v139_v24  ;;  %v190_v30 = vcvt.s32.f32 %v142_v25  ;;  %v132_v37 = vunpack.c.2.s8 %v96_v31  ;;  %v135_v38 = vunpack.c.3.s8 %v96_v31 }
   0xa   :  { %v216_v35 = vpack.c.bf16 %v189_v27, %v186_v26  ;;  %v133_v40 = vunpack.c.2.s8 %v97_v32  ;;  %v136_v41 = vunpack.c.3.s8 %v97_v32  ;;  %v179_v42 = vcvt.s32.f32 %v131_v34  ;;  %v91_v34 = vld [vmem:[%s438_s1 + $0x10] sm:$0xff] }
   0xb   :  { %v217_v39 = vpack.c.bf16 %v190_v30, %v187_v29  ;;  %v182_v43 = vcvt.s32.f32 %v134_v36  ;;  %v180_v44 = vcvt.s32.f32 %v132_v37  ;;  %v183_v45 = vcvt.s32.f32 %v135_v38  ;;  %v89_v30 = vld [vmem:[%s438_s1] sm:$0xff] }
   0xc   :  { %v181_v46 = vcvt.s32.f32 %v133_v40  ;;  %v184_v47 = vcvt.s32.f32 %v136_v41  ;;  %v125_v48 = vunpack.c.0.s8 %v95_v28  ;;  %v128_v49 = vunpack.c.1.s8 %v95_v28 }
   0xd   :  { %v212_v50 = vpack.c.bf16 %v182_v43, %v179_v42  ;;  %v213_v51 = vpack.c.bf16 %v183_v45, %v180_v44  ;;  %v126_v52 = vunpack.c.0.s8 %v96_v31  ;;  %v129_v53 = vunpack.c.1.s8 %v96_v31 }
   0xe   :  { %v214_v54 = vpack.c.bf16 %v184_v47, %v181_v46  ;;  %v127_v55 = vunpack.c.0.s8 %v97_v32  ;;  %v130_v56 = vunpack.c.1.s8 %v97_v32  ;;  %v173_v57 = vcvt.s32.f32 %v125_v48 }
   0xf   :  { %v176_v58 = vcvt.s32.f32 %v128_v49  ;;  %v174_v59 = vcvt.s32.f32 %v126_v52  ;;  %v177_v60 = vcvt.s32.f32 %v129_v53  ;;  %v119_v3 = vunpack.c.2.s8 %v92_v61 }
  0x10   :  { %230 = vmatpush.bf16.xpose.msra.mxu0 %v215_v33  ;;  %259 = vmatpush.bf16.xpose.msra.mxu1 %v216_v35  ;;  %v175_v62 = vcvt.s32.f32 %v127_v55  ;;  %v178_v63 = vcvt.s32.f32 %v130_v56  ;;  %v122_v5 = vunpack.c.3.s8 %v92_v61  ;;  %v120_v6 = vunpack.c.2.s8 %v93_v0 }
  0x11   :  { %288 = vmatpush.bf16.xpose.msra.mxu2 %v217_v39  ;;  %337 = vmatpush.bf16.xpose.msra.mxu3 %v215_v33  ;;  %v209_v2 = vpack.c.bf16 %v176_v58, %v173_v57  ;;  %v210_v4 = vpack.c.bf16 %v177_v60, %v174_v59  ;;  %v123_v7 = vunpack.c.3.s8 %v93_v0  ;;  %v121_v9 = vunpack.c.2.s8 %v94_v1  ;;  %v90_v33 = vld [vmem:[%s438_s1 + $0x8] sm:$0xff] }
  0x12   :  { %v211_v8 = vpack.c.bf16 %v178_v63, %v175_v62  ;;  %v124_v10 = vunpack.c.3.s8 %v94_v1  ;;  %v167_v11 = vcvt.s32.f32 %v119_v3  ;;  %v170_v12 = vcvt.s32.f32 %v122_v5  ;;  %v23_v63 = vld [vmem:[%s439_s0] sm:$0xff]  ;;  %v25_v3 = vld [vmem:[%s439_s0 + $0x10] sm:$0xff] }
  0x13   :  { %v168_v13 = vcvt.s32.f32 %v120_v6  ;;  %v171_v14 = vcvt.s32.f32 %v123_v7  ;;  %v169_v15 = vcvt.s32.f32 %v121_v9  ;;  %v113_v17 = vunpack.c.0.s8 %v92_v61 }
  0x14   :  { %v172_v16 = vcvt.s32.f32 %v124_v10  ;;  %v116_v18 = vunpack.c.1.s8 %v92_v61  ;;  %v206_v19 = vpack.c.bf16 %v170_v12, %v167_v11  ;;  %v114_v21 = vunpack.c.0.s8 %v93_v0 }
  0x15   :  { %v207_v20 = vpack.c.bf16 %v171_v14, %v168_v13  ;;  %v117_v22 = vunpack.c.1.s8 %v93_v0  ;;  %v115_v24 = vunpack.c.0.s8 %v94_v1  ;;  %v118_v25 = vunpack.c.1.s8 %v94_v1  ;;  %v24_v0 = vld [vmem:[%s439_s0 + $0x8] sm:$0xff] }
  0x16   :  { %v208_v23 = vpack.c.bf16 %v172_v16, %v169_v15  ;;  %v161_v26 = vcvt.s32.f32 %v113_v17  ;;  %v164_v27 = vcvt.s32.f32 %v116_v18  ;;  %v162_v28 = vcvt.s32.f32 %v114_v21 }
  0x17   :  { %v165_v29 = vcvt.s32.f32 %v117_v22  ;;  %v163_v31 = vcvt.s32.f32 %v115_v24  ;;  %v166_v32 = vcvt.s32.f32 %v118_v25  ;;  %v107_v36 = vunpack.c.2.s8 %v89_v30 }
  0x18   :  { %231 = vmatpush.bf16.xpose.msra.mxu0 %v212_v50  ;;  %260 = vmatpush.bf16.xpose.msra.mxu1 %v213_v51  ;;  %v203_v35 = vpack.c.bf16 %v164_v27, %v161_v26  ;;  %v110_v38 = vunpack.c.3.s8 %v89_v30  ;;  %v108_v39 = vunpack.c.2.s8 %v90_v33  ;;  %v111_v40 = vunpack.c.3.s8 %v90_v33  ;;  %v26_v27 = vld [vmem:[%s439_s0 + $0x18] sm:$0xff] }
  0x19   :  { %289 = vmatpush.bf16.xpose.msra.mxu2 %v214_v54  ;;  %338 = vmatpush.bf16.xpose.msra.mxu3 %v212_v50  ;;  %v204_v37 = vpack.c.bf16 %v165_v29, %v162_v28  ;;  %v205_v41 = vpack.c.bf16 %v166_v32, %v163_v31  ;;  %v109_v42 = vunpack.c.2.s8 %v91_v34  ;;  %v112_v43 = vunpack.c.3.s8 %v91_v34 }
  0x1a   :  { %v155_v44 = vcvt.s32.f32 %v107_v36  ;;  %v158_v45 = vcvt.s32.f32 %v110_v38  ;;  %v156_v46 = vcvt.s32.f32 %v108_v39  ;;  %v159_v47 = vcvt.s32.f32 %v111_v40 }
  0x1b   :  { %v157_v48 = vcvt.s32.f32 %v109_v42  ;;  %v160_v49 = vcvt.s32.f32 %v112_v43  ;;  %v101_v50 = vunpack.c.0.s8 %v89_v30  ;;  %v104_v51 = vunpack.c.1.s8 %v89_v30  ;;  %v27_v43 = vld [vmem:[%s439_s0 + $0x20] sm:$0xff] }
  0x1c   :  { %v102_v52 = vunpack.c.0.s8 %v90_v33  ;;  %v105_v53 = vunpack.c.1.s8 %v90_v33  ;;  %v200_v54 = vpack.c.bf16 %v158_v45, %v155_v44  ;;  %v201_v55 = vpack.c.bf16 %v159_v47, %v156_v46  ;;  %v28_v44 = vld [vmem:[%s439_s0 + $0x28] sm:$0xff] }
  0x1d   :  { %v202_v56 = vpack.c.bf16 %v160_v49, %v157_v48  ;;  %v103_v57 = vunpack.c.0.s8 %v91_v34  ;;  %v106_v58 = vunpack.c.1.s8 %v91_v34  ;;  %v149_v59 = vcvt.s32.f32 %v101_v50 }
  0x1e   :  { %v152_v60 = vcvt.s32.f32 %v104_v51  ;;  %v150_v61 = vcvt.s32.f32 %v102_v52  ;;  %v153_v62 = vcvt.s32.f32 %v105_v53  ;;  %v29_v6 = vunpack.c.0.s8 %v23_v63 }
  0x1f   :  { %v151_v1 = vcvt.s32.f32 %v103_v57  ;;  %v32_v7 = vunpack.c.1.s8 %v23_v63  ;;  %v33_v9 = vunpack.c.1.s8 %v24_v0  ;;  %v31_v10 = vunpack.c.0.s8 %v25_v3 }
  0x20   :  { %232 = vmatpush.bf16.xpose.msra.mxu0 %v209_v2  ;;  %261 = vmatpush.bf16.xpose.msra.mxu1 %v210_v4  ;;  %v197_v4 = vpack.c.bf16 %v152_v60, %v149_v59  ;;  %v198_v5 = vpack.c.bf16 %v153_v62, %v150_v61  ;;  %v34_v11 = vunpack.c.1.s8 %v25_v3  ;;  %v35_v12 = vunpack.c.2.s8 %v23_v63 }
  0x21   :  { %290 = vmatpush.bf16.xpose.msra.mxu2 %v211_v8  ;;  %339 = vmatpush.bf16.xpose.msra.mxu3 %v209_v2  ;;  %v154_v2 = vcvt.s32.f32 %v106_v58  ;;  %v30_v8 = vunpack.c.0.s8 %v24_v0  ;;  %v38_v13 = vunpack.c.3.s8 %v23_v63  ;;  %v53_v15 = vcvt.s32.f32 %v29_v6 }
  0x22   :  { %v56_v16 = vcvt.s32.f32 %v32_v7  ;;  %v57_v18 = vcvt.s32.f32 %v33_v9  ;;  %v59_v21 = vcvt.s32.f32 %v35_v12  ;;  %v36_v28 = vunpack.c.2.s8 %v24_v0 }
  0x23   :  { %v199_v14 = vpack.c.bf16 %v154_v2, %v151_v1  ;;  %v54_v17 = vcvt.s32.f32 %v30_v8  ;;  %v62_v22 = vcvt.s32.f32 %v38_v13  ;;  %v39_v29 = vunpack.c.3.s8 %v24_v0 }
  0x24   :  { %v37_v30 = vunpack.c.2.s8 %v25_v3  ;;  %v40_v31 = vunpack.c.3.s8 %v25_v3  ;;  %v41_v32 = vunpack.c.0.s8 %v26_v27  ;;  %v44_v33 = vunpack.c.1.s8 %v26_v27 }
  0x25   :  { %v78_v24 = vpack.c.bf16 %v57_v18, %v54_v17  ;;  %v80_v26 = vpack.c.bf16 %v62_v22, %v59_v21  ;;  %v60_v34 = vcvt.s32.f32 %v36_v28  ;;  %v42_v45 = vunpack.c.0.s8 %v27_v43 }
  0x26   :  { %v61_v36 = vcvt.s32.f32 %v37_v30  ;;  %v65_v38 = vcvt.s32.f32 %v41_v32  ;;  %v68_v39 = vcvt.s32.f32 %v44_v33  ;;  %v45_v46 = vunpack.c.1.s8 %v27_v43 }
  0x27   :  { %v43_v47 = vunpack.c.0.s8 %v28_v44  ;;  %v46_v48 = vunpack.c.1.s8 %v28_v44  ;;  %v47_v49 = vunpack.c.2.s8 %v26_v27  ;;  %v50_v50 = vunpack.c.3.s8 %v26_v27 }
  0x28   :  { %233 = vmatpush.bf16.xpose.msra.mxu0 %v206_v19  ;;  %262 = vmatpush.bf16.xpose.msra.mxu1 %v207_v20  ;;  %v58_v20 = vcvt.s32.f32 %v34_v11  ;;  %v83_v42 = vpack.c.bf16 %v68_v39, %v65_v38  ;;  %v66_v51 = vcvt.s32.f32 %v42_v45  ;;  %v69_v52 = vcvt.s32.f32 %v45_v46 }
  0x29   :  { %291 = vmatpush.bf16.xpose.msra.mxu2 %v208_v23  ;;  %340 = vmatpush.bf16.xpose.msra.mxu3 %v206_v19  ;;  %v55_v19 = vcvt.s32.f32 %v31_v10  ;;  %v77_v23 = vpack.c.bf16 %v56_v16, %v53_v15  ;;  %v67_v53 = vcvt.s32.f32 %v43_v47  ;;  %v48_v60 = vunpack.c.2.s8 %v27_v43 }
  0x2a   :  { %v84_v57 = vpack.c.bf16 %v69_v52, %v66_v51  ;;  %v51_v61 = vunpack.c.3.s8 %v27_v43  ;;  %v49_v62 = vunpack.c.2.s8 %v28_v44  ;;  %v52_v63 = vunpack.c.3.s8 %v28_v44 }
  0x2b   :  { %v79_v25 = vpack.c.bf16 %v58_v20, %v55_v19  ;;  %v72_v0 = vcvt.s32.f32 %v48_v60 }
  0x2c   :  { %v75_v1 = vcvt.s32.f32 %v51_v61  ;;  %v73_v2 = vcvt.s32.f32 %v49_v62  ;;  %v76_v3 = vcvt.s32.f32 %v52_v63 }
  0x30   :  { %234 = vmatpush.bf16.xpose.msra.mxu0 %v203_v35  ;;  %263 = vmatpush.bf16.xpose.msra.mxu1 %v204_v37  ;;  %v64_v37 = vcvt.s32.f32 %v40_v31 }
  0x31   :  { %292 = vmatpush.bf16.xpose.msra.mxu2 %v205_v41  ;;  %341 = vmatpush.bf16.xpose.msra.mxu3 %v203_v35  ;;  %v63_v35 = vcvt.s32.f32 %v39_v29 }
  0x32   :  { %v82_v41 = vpack.c.bf16 %v64_v37, %v61_v36 }
  0x33   :  { %v81_v40 = vpack.c.bf16 %v63_v35, %v60_v34 }
  0x38   :  { %235 = vmatpush.bf16.xpose.msra.mxu0 %v200_v54  ;;  %264 = vmatpush.bf16.xpose.msra.mxu1 %v201_v55  ;;  %v71_v55 = vcvt.s32.f32 %v47_v49 }
  0x39   :  { %293 = vmatpush.bf16.xpose.msra.mxu2 %v202_v56  ;;  %342 = vmatpush.bf16.xpose.msra.mxu3 %v200_v54  ;;  %v70_v54 = vcvt.s32.f32 %v46_v48  ;;  %v74_v56 = vcvt.s32.f32 %v50_v50 }
  0x3b   :  { %v85_v58 = vpack.c.bf16 %v70_v54, %v67_v53  ;;  %v86_v59 = vpack.c.bf16 %v74_v56, %v71_v55 }
  0x40   :  { %236 = vmatpush.bf16.xpose.msra.mxu0 %v197_v4  ;;  %265 = vmatpush.bf16.xpose.msra.mxu1 %v198_v5  ;;  %v88_v5 = vpack.c.bf16 %v76_v3, %v73_v2 }
  0x41   :  { %294 = vmatpush.bf16.xpose.msra.mxu2 %v199_v14  ;;  %343 = vmatpush.bf16.xpose.msra.mxu3 %v197_v4  ;;  %v87_v4 = vpack.c.bf16 %v75_v1, %v72_v0 }
  0x47   :  { %237 = vmatmul.bf16.vlgmr.msra.gmra.mxu0 %v77_v23  ;;  %266 = vmatmul.bf16.vlgmr.msra.gmra.mxu1 %v78_v24 }
  0x48   :  { %295 = vmatmul.bf16.vlgmr.msra.gmra.mxu2 %v79_v25  ;;  %242 = vmatmul.bf16.vlgmr.msra.gmra.mxu3 %v80_v26 }
  0x57   :  { %271 = vmatmul.bf16.gmra.mxu1 %v81_v40 }
  0x58   :  { %300 = vmatmul.bf16.gmra.mxu2 %v82_v41  ;;  %247 = vmatmul.bf16.gmra.mxu3 %v83_v42 }
  0x67   :  { %276 = vmatmul.bf16.gmra.mxu1 %v84_v57 }
  0x68   :  { %305 = vmatmul.bf16.gmra.mxu2 %v85_v58  ;;  %252 = vmatmul.bf16.gmra.mxu3 %v86_v59 }
  0x77   :  { %281 = vmatmul.bf16.gmra.mxu1 %v87_v4 }
  0x78   :  { %310 = vmatmul.bf16.gmra.mxu2 %v88_v5 }
  0xc4   :  { %v267_v6 = vpop.f32.mrf.mxu1  ;;  %v238_v7 = vpop.f32.mrf.mxu0 }
  0xc5   :  { %v268_v8 = vadd.f32 %v267_v6, %v238_v7 }
  0xcb   :  { %v296_v9 = vpop.f32.mrf.mxu2  ;;  %v243_v13 = vpop.f32.mrf.mxu3 }
  0xcc   :  { %v297_v10 = vadd.f32 %v296_v9, %v268_v8  ;;  %v269_v11 = vpop.f32.mrf.mxu1  ;;  %v240_v12 = vpop.f32.mrf.mxu0 }
  0xcd   :  { %v270_v14 = vadd.f32 %v269_v11, %v240_v12 }
  0xce   :  { %324 = vst [vmem:[%s440_s2] sm:$0xff] %v297_v10 }
  0xd3   :  { %v298_v15 = vpop.f32.mrf.mxu2  ;;  %v245_v19 = vpop.f32.mrf.mxu3 }
  0xd4   :  { %v299_v16 = vadd.f32 %v298_v15, %v270_v14  ;;  %v272_v17 = vpop.f32.mrf.mxu1 }
  0xd5   :  { %v273_v18 = vadd.f32 %v272_v17, %v243_v13 }
  0xd6   :  { %325 = vst [vmem:[%s440_s2 + $0x8] sm:$0xff] %v299_v16 }
  0xdb   :  { %v301_v20 = vpop.f32.mrf.mxu2  ;;  %v248_v24 = vpop.f32.mrf.mxu3 }
  0xdc   :  { %v302_v21 = vadd.f32 %v301_v20, %v273_v18  ;;  %v274_v22 = vpop.f32.mrf.mxu1 }
  0xdd   :  { %v275_v23 = vadd.f32 %v274_v22, %v245_v19 }
  0xde   :  { %326 = vst [vmem:[%s440_s2 + $0x10] sm:$0xff] %v302_v21 }
  0xe3   :  { %v303_v25 = vpop.f32.mrf.mxu2  ;;  %v250_v32 = vpop.f32.mrf.mxu3 }
  0xe4   :  { %v304_v26 = vadd.f32 %v303_v25, %v275_v23  ;;  %v277_v27 = vpop.f32.mrf.mxu1 }
  0xe5   :  { %v278_v28 = vadd.f32 %v277_v27, %v248_v24 }
  0xe6   :  { %327 = vst [vmem:[%s440_s2 + $0x18] sm:$0xff] %v304_v26 }
  0xeb   :  { %v306_v29 = vpop.f32.mrf.mxu2  ;;  %v253_v37 = vpop.f32.mrf.mxu3 }
  0xec   :  { %v307_v30 = vadd.f32 %v306_v29, %v278_v28  ;;  %v279_v31 = vpop.f32.mrf.mxu1 }
  0xed   :  { %v280_v33 = vadd.f32 %v279_v31, %v250_v32 }
  0xee   :  { %328 = vst [vmem:[%s440_s2 + $0x20] sm:$0xff] %v307_v30 }
  0xf3   :  { %v308_v34 = vpop.f32.mrf.mxu2  ;;  %v255_v42 = vpop.f32.mrf.mxu3 }
  0xf4   :  { %v309_v35 = vadd.f32 %v308_v34, %v280_v33  ;;  %v282_v36 = vpop.f32.mrf.mxu1 }
  0xf5   :  { %v283_v38 = vadd.f32 %v282_v36, %v253_v37 }
  0xf6   :  { %329 = vst [vmem:[%s440_s2 + $0x28] sm:$0xff] %v309_v35 }
  0xfb   :  { %v311_v39 = vpop.f32.mrf.mxu2 }
  0xfc   :  { %v312_v40 = vadd.f32 %v311_v39, %v283_v38  ;;  %v284_v41 = vpop.f32.mrf.mxu1 }
  0xfd   :  { %v285_v43 = vadd.f32 %v284_v41, %v255_v42 }
  0xfe   :  { %330 = vst [vmem:[%s440_s2 + $0x30] sm:$0xff] %v312_v40 }
 0x103   :  { %v313_v44 = vpop.f32.mrf.mxu2 }
 0x104   :  { %v314_v45 = vadd.f32 %v313_v44, %v285_v43 }
 0x106   :  { %331 = vst [vmem:[%s440_s2 + $0x38] sm:$0xff] %v314_v45 }

</bundles_post_ra>
